<compile_context>
chip_gen: v6e
topology: v6e:2x2x1
jax: 0.10.0
libtpu: 0.0.40
codegen_flags: <defaults>
</compile_context>

<pallas_src>
import functools

import jax
import jax.numpy as jnp
from jax.experimental import pallas as pl
from jax.experimental.pallas import tpu as pltpu


def _linear_kernel(w_ref, x_ref, o_ref):
    """VPU FMA on the lane-dense layout: o[j, :] = sum_k w[j, k] * x[k, :].

    w_ref: (out_f, in_f) f32 in SMEM (scalar reads, held once for all tiles).
    x_ref: (in_f, TILE_N) f32 VMEM tile (batch rows on the lane axis).
    o_ref: (out_f, TILE_N) f32 VMEM tile.
    """
    out_f, in_f = w_ref.shape
    x = x_ref[...]                         # (in_f, TILE_N)
    for j in range(out_f):                 # static unroll: 2 * 4 = 8 FMAs
        acc = w_ref[j, 0] * x[0:1, :]
        for k in range(1, in_f):
            acc = acc + w_ref[j, k] * x[k:k + 1, :]
        o_ref[j:j + 1, :] = acc


@functools.partial(jax.jit, static_argnames=("tile_n",))
def feature_extractor(x, weight, *, tile_n=1024):
    """x: (..., 4) f32, weight: (2, 4) f32 -> (..., 2) f32.

    Matches torch.nn.Linear(4, 2, bias=False): y = x @ W.T.
    All transposes/padding here are wrapper-side layout plumbing; the kernel
    only sees the lane-dense (features-on-sublane, rows-on-lane) view.
    """
    out_f, in_f = weight.shape
    assert x.shape[-1] == in_f
    lead = x.shape[:-1]
    n = 1
    for d in lead:
        n *= d
    x2 = x.reshape(n, in_f)

    # Lane-dense layout: (in_f, N) with N padded to a whole number of tiles.
    n_pad = max(128, pl.cdiv(n, 128) * 128)
    tile_n = min(tile_n, n_pad)
    n_pad = pl.cdiv(n_pad, tile_n) * tile_n
    xt = jnp.zeros((in_f, n_pad), x.dtype).at[:, :n].set(x2.T)

    out_t = pl.pallas_call(
        _linear_kernel,
        out_shape=jax.ShapeDtypeStruct((out_f, n_pad), x.dtype),
        grid_spec=pltpu.PrefetchScalarGridSpec(
            num_scalar_prefetch=0,
            grid=(n_pad // tile_n,),
            in_specs=[
                # Weight (32 B) lives in SMEM; no per-tile VMEM tile / DMA.
                pl.BlockSpec(memory_space=pltpu.MemorySpace.SMEM),
                # Streaming input: rows on the lane axis, double-buffered.
                pl.BlockSpec((in_f, tile_n), lambda i: (0, i)),
            ],
            out_specs=pl.BlockSpec((out_f, tile_n), lambda i: (0, i)),
        ),
        compiler_params=pltpu.CompilerParams(
            dimension_semantics=("parallel",),    # shard over TCs on v7x
            vmem_limit_bytes=32 * 1024 * 1024,
        ),
    )(weight, xt)

    return out_t[:, :n].T.reshape(*lead, out_f)


if __name__ == "__main__":
    key = jax.random.PRNGKey(0)
    kx, kw, kx2 = jax.random.split(key, 3)

    # nn.Linear(4, 2, bias=False): weight shape (2, 4), default uniform init
    # bound = 1/sqrt(in_features).
    bound = 1.0 / jnp.sqrt(4.0)
    weight = jax.random.uniform(kw, (2, 4), dtype=jnp.float32,
                                minval=-bound, maxval=bound)

    # Small batch consistent with the module (in_features=4).
    N = 8
    x = jax.random.normal(kx, (N, 4), dtype=jnp.float32)
    out = jax.block_until_ready(feature_extractor(x, weight))
    ref = x @ weight.T
    assert out.shape == (N, 2)
    assert jnp.allclose(out, ref, atol=1e-5, rtol=1e-5), "mismatch (small N)"

    # Larger batch to exercise multi-tile grid + remainder padding.
    N2 = 2500
    x2 = jax.random.normal(kx2, (N2, 4), dtype=jnp.float32)
    out2 = jax.block_until_ready(feature_extractor(x2, weight, tile_n=1024))
    ref2 = x2 @ weight.T
    assert out2.shape == (N2, 2)
    assert jnp.allclose(out2, ref2, atol=1e-5, rtol=1e-5), "mismatch (tiled N)"

    print("KERNEL_OK")
</pallas_src>

<mosaic_0001>
module attributes {stable_mosaic.version = 11 : i64} {
  func.func @_linear_kernel(%arg0: i32, %arg1: memref<2x4xf32, #tpu.memory_space<smem>>, %arg2: memref<4x128xf32, #tpu.memory_space<vmem>>, %arg3: memref<2x128xf32, #tpu.memory_space<vmem>>) attributes {dimension_semantics = [#tpu.dimension_semantics<parallel>], iteration_bounds = array<i64: 1>, scalar_prefetch = 0 : i64, scratch_operands = 0 : i64, tpu.core_type = #tpu.core_type<tc>, window_params = [{transform_indices = @transform_0, window_bounds = array<i64: 2, 4>}, {transform_indices = @transform_1, window_bounds = array<i64: 4, 128>}, {transform_indices = @transform_2, window_bounds = array<i64: 2, 128>}]} {
    %c0 = arith.constant 0 : index
    %c0_0 = arith.constant 0 : index
    %0 = vector.load %arg2[%c0, %c0_0] : memref<4x128xf32, #tpu.memory_space<vmem>>, vector<4x128xf32>
    %c0_1 = arith.constant 0 : index
    %c0_2 = arith.constant 0 : index
    %1 = memref.load %arg1[%c0_1, %c0_2] : memref<2x4xf32, #tpu.memory_space<smem>>
    %2 = vector.extract_strided_slice %0 {offsets = [0, 0], sizes = [1, 128], strides = [1, 1]} : vector<4x128xf32> to vector<1x128xf32>
    %3 = vector.broadcast %1 : f32 to vector<1x128xf32>
    %4 = arith.mulf %3, %2 : vector<1x128xf32>
    %c0_3 = arith.constant 0 : index
    %c1 = arith.constant 1 : index
    %5 = memref.load %arg1[%c0_3, %c1] : memref<2x4xf32, #tpu.memory_space<smem>>
    %6 = vector.extract_strided_slice %0 {offsets = [1, 0], sizes = [1, 128], strides = [1, 1]} : vector<4x128xf32> to vector<1x128xf32>
    %7 = vector.broadcast %5 : f32 to vector<1x128xf32>
    %8 = arith.mulf %7, %6 : vector<1x128xf32>
    %9 = arith.addf %4, %8 : vector<1x128xf32>
    %c0_4 = arith.constant 0 : index
    %c2 = arith.constant 2 : index
    %10 = memref.load %arg1[%c0_4, %c2] : memref<2x4xf32, #tpu.memory_space<smem>>
    %11 = vector.extract_strided_slice %0 {offsets = [2, 0], sizes = [1, 128], strides = [1, 1]} : vector<4x128xf32> to vector<1x128xf32>
    %12 = vector.broadcast %10 : f32 to vector<1x128xf32>
    %13 = arith.mulf %12, %11 : vector<1x128xf32>
    %14 = arith.addf %9, %13 : vector<1x128xf32>
    %c0_5 = arith.constant 0 : index
    %c3 = arith.constant 3 : index
    %15 = memref.load %arg1[%c0_5, %c3] : memref<2x4xf32, #tpu.memory_space<smem>>
    %16 = vector.extract_strided_slice %0 {offsets = [3, 0], sizes = [1, 128], strides = [1, 1]} : vector<4x128xf32> to vector<1x128xf32>
    %17 = vector.broadcast %15 : f32 to vector<1x128xf32>
    %18 = arith.mulf %17, %16 : vector<1x128xf32>
    %19 = arith.addf %14, %18 : vector<1x128xf32>
    %c0_6 = arith.constant 0 : index
    %c0_7 = arith.constant 0 : index
    %20 = vector.load %arg3[%c0_6, %c0_7] : memref<2x128xf32, #tpu.memory_space<vmem>>, vector<1x128xf32>
    tpu.vector_store %arg3[%c0_6, %c0_7], %19 {strides = array<i32>} : memref<2x128xf32, #tpu.memory_space<vmem>>, vector<1x128xf32>,
    %c1_8 = arith.constant 1 : index
    %c0_9 = arith.constant 0 : index
    %21 = memref.load %arg1[%c1_8, %c0_9] : memref<2x4xf32, #tpu.memory_space<smem>>
    %22 = vector.extract_strided_slice %0 {offsets = [0, 0], sizes = [1, 128], strides = [1, 1]} : vector<4x128xf32> to vector<1x128xf32>
    %23 = vector.broadcast %21 : f32 to vector<1x128xf32>
    %24 = arith.mulf %23, %22 : vector<1x128xf32>
    %c1_10 = arith.constant 1 : index
    %c1_11 = arith.constant 1 : index
    %25 = memref.load %arg1[%c1_10, %c1_11] : memref<2x4xf32, #tpu.memory_space<smem>>
    %26 = vector.extract_strided_slice %0 {offsets = [1, 0], sizes = [1, 128], strides = [1, 1]} : vector<4x128xf32> to vector<1x128xf32>
    %27 = vector.broadcast %25 : f32 to vector<1x128xf32>
    %28 = arith.mulf %27, %26 : vector<1x128xf32>
    %29 = arith.addf %24, %28 : vector<1x128xf32>
    %c1_12 = arith.constant 1 : index
    %c2_13 = arith.constant 2 : index
    %30 = memref.load %arg1[%c1_12, %c2_13] : memref<2x4xf32, #tpu.memory_space<smem>>
    %31 = vector.extract_strided_slice %0 {offsets = [2, 0], sizes = [1, 128], strides = [1, 1]} : vector<4x128xf32> to vector<1x128xf32>
    %32 = vector.broadcast %30 : f32 to vector<1x128xf32>
    %33 = arith.mulf %32, %31 : vector<1x128xf32>
    %34 = arith.addf %29, %33 : vector<1x128xf32>
    %c1_14 = arith.constant 1 : index
    %c3_15 = arith.constant 3 : index
    %35 = memref.load %arg1[%c1_14, %c3_15] : memref<2x4xf32, #tpu.memory_space<smem>>
    %36 = vector.extract_strided_slice %0 {offsets = [3, 0], sizes = [1, 128], strides = [1, 1]} : vector<4x128xf32> to vector<1x128xf32>
    %37 = vector.broadcast %35 : f32 to vector<1x128xf32>
    %38 = arith.mulf %37, %36 : vector<1x128xf32>
    %39 = arith.addf %34, %38 : vector<1x128xf32>
    %c1_16 = arith.constant 1 : index
    %c0_17 = arith.constant 0 : index
    %40 = vector.load %arg3[%c1_16, %c0_17] : memref<2x128xf32, #tpu.memory_space<vmem>>, vector<1x128xf32>
    tpu.vector_store %arg3[%c1_16, %c0_17], %39 {strides = array<i32>} : memref<2x128xf32, #tpu.memory_space<vmem>>, vector<1x128xf32>,
    return
  }
  func.func @transform_0(%arg0: i32) -> (i32, i32) {
    %c0_i32 = arith.constant 0 : i32
    %c0_i32_0 = arith.constant 0 : i32
    %c0_i32_1 = arith.constant 0 : i32
    return %c0_i32, %c0_i32_0 : i32, i32
  }
  func.func @transform_1(%arg0: i32) -> (i32, i32) {
    %c0_i32 = arith.constant 0 : i32
    %c0_i32_0 = arith.constant 0 : i32
    return %c0_i32, %arg0 : i32, i32
  }
  func.func @transform_2(%arg0: i32) -> (i32, i32) {
    %c0_i32 = arith.constant 0 : i32
    %c0_i32_0 = arith.constant 0 : i32
    return %c0_i32, %arg0 : i32, i32
  }
}

</mosaic_0001>

<bundles_post_ra>
// kernel: feature_extractor.1
= control target key start
LH: loop header
LB: loop body
LE: loop exit
PB: predicated region body
PF: predicated region fallthrough
CT: control target
= control target key end

     0   :  { %7 = vsyncpa [#allocation3], 0  ;;  %s130_s0 = inlined_call_operand.vmem [shape: f32[2,4], index: 0, kind: input, shape index: {}]   ;;  %s131_s1 = inlined_call_operand.vmem [shape: f32[4,128], index: 1, kind: input, shape index: {}]   ;;  %s132_s2 = inlined_call_operand.vmem [shape: f32[2,128], index: 2, kind: output, shape index: {}]  }
   0x1   :  { %s14_s11 = sshll.u32 %s130_s0, 4  ;;  %s15_s11 = int_to_ptr.vmem [resolvable:$true] %s14_s11 }
   0x2   :  { %s88_s12 = scalar_lea.vmem %s15_s11, 32  ;;  %p93_p1 = scmp.lt.s32.totalorder %s15_s11, %s15_s11 }
   0x3   :  { %p89_p0 = scmp.ne.s32.totalorder %s15_s11, %s88_s12  ;;  %p94_p2 = scmp.lt.s32.totalorder %s88_s12, %s88_s12 }
   0x5   :  { %p95_p3 = por %p94_p2, %p93_p1 }
   0x7   :  { %p96_p4 = pnand %p95_p3, %p89_p0 }
   0x9   :  { %99 = shalt.err (!%p96_p4)
}
   0xa   :  { %s102_s13 = smov [#allocation2]  }
   0xb   :  { %17 = dma.vmem_to_smem %s15_s11, 32, %s102_s13, [#allocation3]  }
   0xc   :  { %100 = dma.done.wait [#allocation3], 32  }
   0xd   :  { %101 = vsyncadd [#allocation3], 4294967264 }
   0xe   :  { %23 = sfence }
   0xf   :  { %s25_s14 = sld [smem:[#allocation2]]  ;;  %v24_v0 = vld [vmem:[%s131_s1] sm:$0xf] }
  0x10   :  { %s80_s15 = sld [smem:[#allocation2 + $0x1]] }
  0x11   :  { %s81_s16 = sld [smem:[#allocation2 + $0x2]] }
  0x12   :  { %s82_s17 = sld [smem:[#allocation2 + $0x3]] }
  0x13   :  { %s83_s18 = sld [smem:[#allocation2 + $0x80]] }
  0x14   :  { %s84_s20 = sld [smem:[#allocation2 + $0x81]] }
  0x15   :  { %v26_v1 = vstv %s25_s14  ;;  %s85_s21 = sld [smem:[#allocation2 + $0x82]] }
  0x16   :  { %v29_v2 = vstv %s80_s15  ;;  %s86_s22 = sld [smem:[#allocation2 + $0x83]]  ;;  %v27_v3 = vmul.f32 %v26_v1, %v24_v0 }
  0x17   :  { %v30_v4 = vmul.f32 %v29_v2, %v24_v0  ;;  %v36_v5 = vstv %s81_s16 }
  0x18   :  { %v37_v6 = vmul.f32 %v36_v5, %v24_v0  ;;  %v43_v7 = vstv %s82_s17 }
  0x19   :  { %v32_v8 = vrot.slane %v30_v4, 1  ;;  %v44_v9 = vmul.f32 %v43_v7, %v24_v0  ;;  %v51_v10 = vstv %s83_s18 }
  0x1a   :  { %v39_v11 = vrot.slane %v37_v6, 2  ;;  %v52_v12 = vmul.f32 %v51_v10, %v24_v0  ;;  %v54_v13 = vstv %s84_s20 }
  0x1b   :  { %v34_v14 = vadd.f32 %v32_v8, %v27_v3  ;;  %v46_v15 = vrot.slane %v44_v9, 3  ;;  %v55_v16 = vmul.f32 %v54_v13, %v24_v0  ;;  %v61_v17 = vstv %s85_s21 }
  0x1c   :  { %v62_v18 = vmul.f32 %v61_v17, %v24_v0  ;;  %v68_v19 = vstv %s86_s22 }
  0x1d   :  { %v41_v20 = vadd.f32 %v39_v11, %v34_v14  ;;  %v57_v21 = vrot.slane %v55_v16, 1  ;;  %v69_v22 = vmul.f32 %v68_v19, %v24_v0 }
  0x1e   :  { %v64_v23 = vrot.slane %v62_v18, 2 }
  0x1f   :  { %v48_v24 = vadd.f32 %v46_v15, %v41_v20  ;;  %v59_v25 = vadd.f32 %v57_v21, %v52_v12  ;;  %v71_v26 = vrot.slane %v69_v22, 3 }
  0x21   :  { %49 = vst [vmem:[%s132_s2] sm:$0x1] %v48_v24  ;;  %v66_v27 = vadd.f32 %v64_v23, %v59_v25 }
  0x23   :  { %v73_v28 = vadd.f32 %v71_v26, %v66_v27 }
  0x25   :  { %74 = vst [vmem:[%s132_s2 + $0x1] sm:$0x1] %v73_v28 }
  0x26   :  { %79 = vsyncpa [#allocation3], 1 }

</bundles_post_ra>
